<compile_context>
chip_gen: v7x
topology: tpu7x:2x2x1
jax: 0.10.0
libtpu: 0.0.40
codegen_flags: <defaults>
</compile_context>

<pallas_src>
import jax
import jax.numpy as jnp
import numpy as np
from jax.experimental import pallas as pl
from jax.experimental.pallas import tpu as pltpu

# ----------------------------- hyper-params -----------------------------
B, N = 2, 8              # batch, sequence length
D_IN = 32                # d_in  (d_model)
D_HID = 128              # d_hid (d_inner = 4 * d_model) -> lane-dense inner matmul
K1, K2 = 3, 1            # fft_conv1d_kernel_size
PAD1 = (K1 - 1) // 2     # ConvNorm 'same' padding for the k=3 conv
ROWS = B * N             # all (batch, position) rows flattened along sublanes


def _softplus(x):
    # matches torch.nn.functional.softplus (threshold=20)
    return jnp.where(x > 20.0, x, jnp.log1p(jnp.exp(jnp.minimum(x, 20.0))))


# ------------------------------- kernel ---------------------------------
def ff_kernel(x_ref, w1_ref, b1_ref, w2_ref, b2_ref, out_ref):
    x = x_ref[...]                                         # (ROWS, D_IN)

    # im2col for the k=3 'same' conv: lane-concat of [x[n-1], x[n], x[n+1]].
    # Sublane shifts go to the XLU (pltpu.roll, non-negative shifts only:
    # shift ROWS-1 == circular shift by -1).  Rows that would read across a
    # sequence/batch boundary are zeroed (conv zero-padding + de-contaminates
    # the circular wrap between flattened batch elements).
    pos = jax.lax.broadcasted_iota(jnp.int32, (ROWS, D_IN), 0) % N
    left = jnp.where(pos == 0, 0.0, pltpu.roll(x, 1, axis=0))            # x[n-1]
    right = jnp.where(pos == N - 1, 0.0, pltpu.roll(x, ROWS - 1, axis=0))  # x[n+1]
    im = jnp.concatenate([left, x, right], axis=-1)        # (ROWS, K1*D_IN)

    # Conv1d(d_in -> d_hid, k=3, 'same') == single im2col matmul on the MXU.
    h = jnp.dot(im, w1_ref[...], preferred_element_type=jnp.float32) + b1_ref[...]
    # Mish: x * tanh(softplus(x))  (exp/tanh run on the EUP slot)
    h = h * jnp.tanh(_softplus(h))

    # Conv1d(d_hid -> d_in, k=1) == plain matmul; dropout = identity (eval).
    y = jnp.dot(h, w2_ref[...], preferred_element_type=jnp.float32) + b2_ref[...]

    out_ref[...] = y + x                                   # residual add


# ------------------------------- wrapper ---------------------------------
def prep_params(p):
    """One-time re-layout of PyTorch Conv1d weights into matmul form (hoisted
    out of the per-call path)."""
    # w1: (D_HID, D_IN, K1) -> (K1*D_IN, D_HID), rows ordered t-major then i,
    # matching the lane-concat order [x[n-1] | x[n] | x[n+1]] in the kernel.
    w1f = jnp.transpose(p['w1'], (2, 1, 0)).reshape(K1 * D_IN, D_HID)
    # w2: (D_IN, D_HID, 1) -> (D_HID, D_IN)
    w2f = p['w2'][:, :, 0].T
    return (w1f, p['b1'][None, :], w2f, p['b2'][None, :])


def positionwise_ff(x, prepped):
    w1f, b1, w2f, b2 = prepped
    x2d = x.reshape(ROWS, D_IN)                            # flatten (B, N) rows
    out2d = pl.pallas_call(
        ff_kernel,
        out_shape=jax.ShapeDtypeStruct((ROWS, D_IN), jnp.float32),
        grid=(1,),
        in_specs=[
            pl.BlockSpec((ROWS, D_IN), lambda i: (0, 0)),            # x slab
            pl.BlockSpec((K1 * D_IN, D_HID), lambda i: (0, 0)),      # w1 (im2col)
            pl.BlockSpec((1, D_HID), lambda i: (0, 0)),              # b1
            pl.BlockSpec((D_HID, D_IN), lambda i: (0, 0)),           # w2
            pl.BlockSpec((1, D_IN), lambda i: (0, 0)),               # b2
        ],
        out_specs=pl.BlockSpec((ROWS, D_IN), lambda i: (0, 0)),
        compiler_params=pltpu.CompilerParams(
            dimension_semantics=("arbitrary",)),
    )(x2d, w1f, b1, w2f, b2)
    return out2d.reshape(B, N, D_IN)


# --------------------------- parameter init ------------------------------
def make_params(key):
    ks = jax.random.split(key, 4)
    u = lambda k, shape, fan_in: jax.random.uniform(
        k, shape, jnp.float32, -1.0 / np.sqrt(fan_in), 1.0 / np.sqrt(fan_in))
    p = {}
    # ConvNorm weights use PyTorch Conv1d layout: (out_channels, in_channels, k)
    p['w1'] = u(ks[0], (D_HID, D_IN, K1), D_IN * K1)
    p['b1'] = u(ks[1], (D_HID,), D_IN * K1)
    p['w2'] = u(ks[2], (D_IN, D_HID, K2), D_HID * K2)
    p['b2'] = u(ks[3], (D_IN,), D_HID * K2)
    return p


# ------------------------- pure-JAX reference ----------------------------
def positionwise_ff_reference(x, p):
    residual = x
    hcl = jnp.transpose(x, (0, 2, 1))                       # (B, C, L)
    c1 = jax.lax.conv_general_dilated(hcl, p['w1'], (1,), [(PAD1, PAD1)],
                                      dimension_numbers=('NCH', 'OIH', 'NCH'))
    c1 = c1 + p['b1'][None, :, None]
    c1 = c1 * jnp.tanh(_softplus(c1))                       # Mish
    c2 = jax.lax.conv_general_dilated(c1, p['w2'], (1,), [(0, 0)],
                                      dimension_numbers=('NCH', 'OIH', 'NCH'))
    c2 = c2 + p['b2'][None, :, None]
    return jnp.transpose(c2, (0, 2, 1)) + residual          # dropout = identity


# --------------------------------- main -----------------------------------
if __name__ == "__main__":
    key = jax.random.PRNGKey(0)
    kx, kp = jax.random.split(key, 2)
    x = jax.random.normal(kx, (B, N, D_IN), jnp.float32)

    params = make_params(kp)
    prepped = prep_params(params)     # hoisted once, outside the call path

    out = positionwise_ff(x, prepped)
    out = jax.block_until_ready(out)

    out_ref = positionwise_ff_reference(x, params)
    np.testing.assert_allclose(np.asarray(out), np.asarray(out_ref),
                               atol=2e-3, rtol=2e-3)
    assert np.isfinite(np.asarray(out)).all()
    # TODO(synk): dropout is implemented as identity (eval mode); training-mode
    # stochastic masking would need pltpu.prng_* inside the kernel.
    print("KERNEL_OK")
</pallas_src>

<mosaic_0001>
module attributes {stable_mosaic.version = 11 : i64} {
  func.func @ff_kernel(%arg0: i32, %arg1: memref<16x32xf32, #tpu.memory_space<vmem>>, %arg2: memref<96x128xf32, #tpu.memory_space<vmem>>, %arg3: memref<1x128xf32, #tpu.memory_space<vmem>>, %arg4: memref<128x32xf32, #tpu.memory_space<vmem>>, %arg5: memref<1x32xf32, #tpu.memory_space<vmem>>, %arg6: memref<16x32xf32, #tpu.memory_space<vmem>>) attributes {dimension_semantics = [#tpu.dimension_semantics<arbitrary>], iteration_bounds = array<i64: 1>, scalar_prefetch = 0 : i64, scratch_operands = 0 : i64, tpu.core_type = #tpu.core_type<tc>, window_params = [{pipeline_mode = #tpu.pipeline_mode<synchronous>, transform_indices = @transform_0, window_bounds = array<i64: 16, 32>}, {pipeline_mode = #tpu.pipeline_mode<synchronous>, transform_indices = @transform_1, window_bounds = array<i64: 96, 128>}, {pipeline_mode = #tpu.pipeline_mode<synchronous>, transform_indices = @transform_2, window_bounds = array<i64: 1, 128>}, {pipeline_mode = #tpu.pipeline_mode<synchronous>, transform_indices = @transform_3, window_bounds = array<i64: 128, 32>}, {pipeline_mode = #tpu.pipeline_mode<synchronous>, transform_indices = @transform_4, window_bounds = array<i64: 1, 32>}, {pipeline_mode = #tpu.pipeline_mode<synchronous>, transform_indices = @transform_5, window_bounds = array<i64: 16, 32>}]} {
    %c0 = arith.constant 0 : index
    %c0_0 = arith.constant 0 : index
    %0 = vector.load %arg1[%c0, %c0_0] : memref<16x32xf32, #tpu.memory_space<vmem>>, vector<16x32xf32>
    %1 = tpu.iota {dimensions = array<i32: 0>} : vector<16x32xi32>
    %c8_i32 = arith.constant 8 : i32
    %c0_i32 = arith.constant 0 : i32
    %2 = arith.cmpi eq, %c8_i32, %c0_i32 : i32
    %c1_i32 = arith.constant 1 : i32
    %3 = arith.select %2, %c1_i32, %c8_i32 : i32
    %4 = vector.broadcast %3 : i32 to vector<16x32xi32>
    %5 = arith.remsi %1, %4 : vector<16x32xi32>
    %c0_i32_1 = arith.constant 0 : i32
    %6 = vector.broadcast %c0_i32_1 : i32 to vector<16x32xi32>
    %7 = arith.cmpi ne, %5, %6 : vector<16x32xi32>
    %c0_i32_2 = arith.constant 0 : i32
    %8 = vector.broadcast %c0_i32_2 : i32 to vector<16x32xi32>
    %9 = arith.cmpi slt, %5, %8 : vector<16x32xi32>
    %c0_i32_3 = arith.constant 0 : i32
    %10 = arith.cmpi slt, %3, %c0_i32_3 : i32
    %11 = vector.broadcast %10 : i1 to vector<16x32xi1>
    %12 = vector.broadcast %11 : vector<16x32xi1> to vector<16x32xi1>
    %13 = arith.xori %9, %12 : vector<16x32xi1>
    %14 = arith.andi %13, %7 : vector<16x32xi1>
    %15 = vector.broadcast %3 : i32 to vector<16x32xi32>
    %16 = arith.addi %5, %15 : vector<16x32xi32>
    %17 = arith.select %14, %16, %5 : vector<16x32xi1>, vector<16x32xi32>
    %c0_i32_4 = arith.constant 0 : i32
    %18 = vector.broadcast %c0_i32_4 : i32 to vector<16x32xi32>
    %19 = arith.cmpi eq, %17, %18 : vector<16x32xi32>
    %c1_i32_5 = arith.constant 1 : i32
    %20 = tpu.dynamic_rotate %0 by %c1_i32_5 dim 0 : vector<16x32xf32>, i32 -> vector<16x32xf32>
    %cst = arith.constant 0.000000e+00 : f32
    %21 = vector.broadcast %cst : f32 to vector<16x32xf32>
    %22 = arith.select %19, %21, %20 : vector<16x32xi1>, vector<16x32xf32>
    %c7_i32 = arith.constant 7 : i32
    %23 = vector.broadcast %c7_i32 : i32 to vector<16x32xi32>
    %24 = arith.cmpi eq, %17, %23 : vector<16x32xi32>
    %c15_i32 = arith.constant 15 : i32
    %25 = tpu.dynamic_rotate %0 by %c15_i32 dim 0 : vector<16x32xf32>, i32 -> vector<16x32xf32>
    %cst_6 = arith.constant 0.000000e+00 : f32
    %26 = vector.broadcast %cst_6 : f32 to vector<16x32xf32>
    %27 = arith.select %24, %26, %25 : vector<16x32xi1>, vector<16x32xf32>
    %28 = tpu.concatenate %22, %0, %27 in 1 : vector<16x32xf32>, vector<16x32xf32>, vector<16x32xf32> -> vector<16x96xf32>
    %c0_7 = arith.constant 0 : index
    %c0_8 = arith.constant 0 : index
    %29 = vector.load %arg2[%c0_7, %c0_8] : memref<96x128xf32, #tpu.memory_space<vmem>>, vector<96x128xf32>
    %cst_9 = arith.constant dense<0.000000e+00> : vector<16x128xf32>
    %30 = tpu.matmul %28, %29, %cst_9 {dimension_numbers = #tpu.dot_dimension_numbers<[1], [0], [0], [1], [0, 0, 1, 1], [], []>} : vector<16x96xf32>, vector<96x128xf32>, vector<16x128xf32> -> vector<16x128xf32>
    %c0_10 = arith.constant 0 : index
    %c0_11 = arith.constant 0 : index
    %31 = vector.load %arg3[%c0_10, %c0_11] : memref<1x128xf32, #tpu.memory_space<vmem>>, vector<1x128xf32>
    %32 = vector.broadcast %31 : vector<1x128xf32> to vector<16x128xf32>
    %33 = arith.addf %30, %32 : vector<16x128xf32>
    %cst_12 = arith.constant 2.000000e+01 : f32
    %34 = vector.broadcast %cst_12 : f32 to vector<16x128xf32>
    %35 = arith.cmpf ogt, %33, %34 : vector<16x128xf32>
    %cst_13 = arith.constant 2.000000e+01 : f32
    %36 = vector.broadcast %cst_13 : f32 to vector<16x128xf32>
    %37 = arith.minimumf %33, %36 : vector<16x128xf32>
    %38 = math.exp %37 : vector<16x128xf32>
    %39 = math.log1p %38 : vector<16x128xf32>
    %40 = arith.select %35, %33, %39 : vector<16x128xi1>, vector<16x128xf32>
    %41 = math.tanh %40 : vector<16x128xf32>
    %42 = arith.mulf %33, %41 : vector<16x128xf32>
    %c0_14 = arith.constant 0 : index
    %c0_15 = arith.constant 0 : index
    %43 = vector.load %arg4[%c0_14, %c0_15] : memref<128x32xf32, #tpu.memory_space<vmem>>, vector<128x32xf32>
    %cst_16 = arith.constant dense<0.000000e+00> : vector<16x32xf32>
    %44 = tpu.matmul %42, %43, %cst_16 {dimension_numbers = #tpu.dot_dimension_numbers<[1], [0], [0], [1], [0, 0, 1, 1], [], []>} : vector<16x128xf32>, vector<128x32xf32>, vector<16x32xf32> -> vector<16x32xf32>
    %c0_17 = arith.constant 0 : index
    %c0_18 = arith.constant 0 : index
    %45 = vector.load %arg5[%c0_17, %c0_18] : memref<1x32xf32, #tpu.memory_space<vmem>>, vector<1x32xf32>
    %46 = vector.broadcast %45 : vector<1x32xf32> to vector<16x32xf32>
    %47 = arith.addf %44, %46 : vector<16x32xf32>
    %48 = arith.addf %47, %0 : vector<16x32xf32>
    %c0_19 = arith.constant 0 : index
    %c0_20 = arith.constant 0 : index
    %49 = vector.load %arg6[%c0_19, %c0_20] : memref<16x32xf32, #tpu.memory_space<vmem>>, vector<16x32xf32>
    tpu.vector_store %arg6[%c0_19, %c0_20], %48 {strides = array<i32>} : memref<16x32xf32, #tpu.memory_space<vmem>>, vector<16x32xf32>,
    return
  }
  func.func @transform_0(%arg0: i32) -> (i32, i32) {
    %c0_i32 = arith.constant 0 : i32
    %c0_i32_0 = arith.constant 0 : i32
    %c0_i32_1 = arith.constant 0 : i32
    return %c0_i32, %c0_i32_0 : i32, i32
  }
  func.func @transform_1(%arg0: i32) -> (i32, i32) {
    %c0_i32 = arith.constant 0 : i32
    %c0_i32_0 = arith.constant 0 : i32
    %c0_i32_1 = arith.constant 0 : i32
    return %c0_i32, %c0_i32_0 : i32, i32
  }
  func.func @transform_2(%arg0: i32) -> (i32, i32) {
    %c0_i32 = arith.constant 0 : i32
    %c0_i32_0 = arith.constant 0 : i32
    %c0_i32_1 = arith.constant 0 : i32
    return %c0_i32, %c0_i32_0 : i32, i32
  }
  func.func @transform_3(%arg0: i32) -> (i32, i32) {
    %c0_i32 = arith.constant 0 : i32
    %c0_i32_0 = arith.constant 0 : i32
    %c0_i32_1 = arith.constant 0 : i32
    return %c0_i32, %c0_i32_0 : i32, i32
  }
  func.func @transform_4(%arg0: i32) -> (i32, i32) {
    %c0_i32 = arith.constant 0 : i32
    %c0_i32_0 = arith.constant 0 : i32
    %c0_i32_1 = arith.constant 0 : i32
    return %c0_i32, %c0_i32_0 : i32, i32
  }
  func.func @transform_5(%arg0: i32) -> (i32, i32) {
    %c0_i32 = arith.constant 0 : i32
    %c0_i32_0 = arith.constant 0 : i32
    %c0_i32_1 = arith.constant 0 : i32
    return %c0_i32, %c0_i32_0 : i32, i32
  }
}

</mosaic_0001>

<bundles_post_ra>
// kernel: tpu_custom_call.1
= control target key start
LH: loop header
LB: loop body
LE: loop exit
PB: predicated region body
PF: predicated region fallthrough
CT: control target
= control target key end

     0   :  { %v23_v2 = vlaneseq  ;;  %s536_s24 = smov 32   ;;  %s707_s0 = inlined_call_operand.vmem [shape: f32[16,32], index: 0, kind: input, shape index: {}]   ;;  %s708_s1 = inlined_call_operand.vmem [shape: f32[96,128], index: 1, kind: input, shape index: {}]   ;;  %s709_s2 = inlined_call_operand.vmem [shape: f32[1,128], index: 2, kind: input, shape index: {}]   ;;  %s710_s3 = inlined_call_operand.vmem [shape: f32[128,32], index: 3, kind: input, shape index: {}]   ;;  %s711_s4 = inlined_call_operand.vmem [shape: f32[1,32], index: 4, kind: input, shape index: {}]   ;;  %s712_s5 = inlined_call_operand.hbm [shape: f32[16,32], index: 5, kind: output, shape index: {}]  }
   0x1   :  { %v574_v0 = vld [vmem:[%s707_s0] sm:$0xff]  ;;  %v579_v1 = vld [vmem:[%s707_s0 + $0x8] sm:$0xff]  ;;  %v92_v8 = vld [vmem:[%s708_s1 + $0x10] sm:$0xff] }
   0x2   :  { %v90_v3 = vld [vmem:[%s708_s1] sm:$0xff]  ;;  %70 = vrot.lane.b32.xlu0 %v574_v0, %s536_s24  ;;  %v52_v4 = vrot.slane %v574_v0, 7  ;;  %v61_v5 = vrot.slane %v574_v0, 1  ;;  %v62_v6 = vrot.slane %v579_v1, 1  ;;  %v91_v7 = vld [vmem:[%s708_s1 + $0x8] sm:$0xff]  ;;  %v93_v9 = vld [vmem:[%s708_s1 + $0x18] sm:$0xff] }
   0x3   :  { %v24_v10 = vshrl.u32 %v23_v2, 7  ;;  %v439_v11 = vpack.c.bf16 %v91_v7, %v90_v3  ;;  %v443_v12 = vpack.c.bf16 %v93_v9, %v92_v8  ;;  %v94_v13 = vld [vmem:[%s708_s1 + $0x20] sm:$0xff]  ;;  %v95_v14 = vld [vmem:[%s708_s1 + $0x28] sm:$0xff]  ;;  %v53_v15 = vrot.slane %v579_v1, 7 }
   0x4   :  { %v447_v20 = vpack.c.bf16 %v95_v14, %v94_v13 }
   0x5   :  { %v30_v16 = vand.u32 7, %v24_v10  ;;  %vm63_vm0 = vcmp.lt.s32.totalorder %v24_v10, 7  ;;  %v25_v17 = vadd.s32 8, %v24_v10  ;;  %440 = vmatprep.subr.bf16.mxu0 %v439_v11  ;;  %vm54_vm1 = vcmp.lt.s32.totalorder %v24_v10, 1 }
   0x6   :  { %v64_v18 = vsel %vm63_vm0, %v61_v5, %v62_v6  ;;  %72 = vrot.lane.b32.xlu0 %v579_v1, %s536_s24  ;;  %v65_v19 = vsel %vm63_vm0, %v62_v6, %v61_v5  ;;  %442 = vmatpush3.bf16.msra.mxu0 %v439_v11 }
   0x7   :  { %10 = vsyncpa [#allocation3], 0  ;;  %vm59_vm2 = vcmp.eq.s32.totalorder %v30_v16, 7  ;;  %v37_v21 = vand.u32 7, %v25_v17  ;;  %444 = vmatprep.subr.bf16.mxu0 %v443_v12  ;;  %vm605_vm3 = vcmp.eq.s32.totalorder %v30_v16, 0  ;;  %v56_v23 = vsel %vm54_vm1, %v53_v15, %v52_v4  ;;  %v96_v25 = vld [vmem:[%s708_s1 + $0x30] sm:$0xff] }
   0x8   :  { %v66_v24 = vsel %vm59_vm2, 0.0, %v64_v18  ;;  %v97_v26 = vld [vmem:[%s708_s1 + $0x38] sm:$0xff]  ;;  %v57_v27 = vsel %vm605_vm3, 0.0, %v56_v23  ;;  %v55_v28 = vsel %vm54_vm1, %v52_v4, %v53_v15  ;;  %s537_s13 = smov 64   ;;  %v98_v33 = vld [vmem:[%s708_s1 + $0x40] sm:$0xff]  ;;  %v99_v34 = vld [vmem:[%s708_s1 + $0x48] sm:$0xff] }
   0x9   :  { %78 = vrot.lane.b32.xlu1 %v66_v24, %s537_s13  ;;  %vm60_vm4 = vcmp.eq.s32.totalorder %v37_v21, 7  ;;  %vm617_vm5 = vcmp.eq.s32.totalorder %v37_v21, 0  ;;  %v451_v32 = vpack.c.bf16 %v97_v26, %v96_v25  ;;  %v455_v35 = vpack.c.bf16 %v99_v34, %v98_v33  ;;  %v100_v36 = vld [vmem:[%s708_s1 + $0x50] sm:$0xff]  ;;  %v101_v37 = vld [vmem:[%s708_s1 + $0x58] sm:$0xff]  ;;  %v223_v47 = vld [vmem:[%s710_s3] sm:$0xff]  ;;  %s538_s27 = smov [#allocation2]  }
   0xa   :  { %v67_v30 = vsel %vm60_vm4, 0.0, %v65_v19  ;;  %446 = vmatpush3.bf16.msra.mxu0 %v443_v12  ;;  %v58_v31 = vsel %vm617_vm5, 0.0, %v55_v28  ;;  %v459_v38 = vpack.c.bf16 %v101_v37, %v100_v36  ;;  %vm84_vm6 = vcmask 261120   ;;  %v224_v48 = vld [vmem:[%s710_s3 + $0x8] sm:$0xff]  ;;  %v225_v50 = vld [vmem:[%s710_s3 + $0x10] sm:$0xff]  ;;  %v226_v51 = vld [vmem:[%s710_s3 + $0x18] sm:$0xff] }
   0xb   :  { %448 = vmatprep.subr.bf16.mxu0 %v447_v20  ;;  %vm87_vm7 = vcmask 523264   ;;  %vm109_vm8 = vcmask 785408   ;;  %v463_v49 = vpack.c.bf16 %v224_v48, %v223_v47  ;;  %v467_v52 = vpack.c.bf16 %v226_v51, %v225_v50  ;;  %v227_v53 = vld [vmem:[%s710_s3 + $0x20] sm:$0xff]  ;;  %v228_v54 = vld [vmem:[%s710_s3 + $0x28] sm:$0xff]  ;;  %v229_v56 = vld [vmem:[%s710_s3 + $0x30] sm:$0xff]  ;;  %s330_s28 = sshll.u32 %s538_s27, 4  ;;  %s331_s28 = int_to_ptr.vmem [resolvable:$true] %s330_s28 }
   0xc   :  { %v471_v55 = vpack.c.bf16 %v228_v54, %v227_v53  ;;  %v230_v57 = vld [vmem:[%s710_s3 + $0x38] sm:$0xff]  ;;  %v231_v59 = vld [vmem:[%s710_s3 + $0x40] sm:$0xff]  ;;  %v232_v60 = vld [vmem:[%s710_s3 + $0x48] sm:$0xff]  ;;  %s512_s29 = scalar_lea.vmem %s331_s28, 256  ;;  %p517_p1 = scmp.lt.s32.totalorder %s331_s28, %s331_s28 }
   0xd   :  { %80 = vrot.lane.b32.xlu1 %v67_v30, %s537_s13  ;;  %464 = vmatprep.subr.bf16.mxu1 %v463_v49  ;;  %v475_v58 = vpack.c.bf16 %v230_v57, %v229_v56  ;;  %v479_v61 = vpack.c.bf16 %v232_v60, %v231_v59  ;;  %v233_v62 = vld [vmem:[%s710_s3 + $0x50] sm:$0xff]  ;;  %v234_v63 = vld [vmem:[%s710_s3 + $0x58] sm:$0xff]  ;;  %v235_v3 = vld [vmem:[%s710_s3 + $0x60] sm:$0xff]  ;;  %p513_p0 = scmp.ne.s32.totalorder %s331_s28, %s512_s29  ;;  %p518_p2 = scmp.lt.s32.totalorder %s512_s29, %s512_s29 }
   0xe   :  { %450 = vmatpush3.bf16.msra.mxu0 %v447_v20  ;;  %466 = vmatpush3.bf16.msra.mxu1 %v463_v49  ;;  %v483_v2 = vpack.c.bf16 %v234_v63, %v233_v62  ;;  %v236_v4 = vld [vmem:[%s710_s3 + $0x68] sm:$0xff]  ;;  %v237_v6 = vld [vmem:[%s710_s3 + $0x70] sm:$0xff]  ;;  %v238_v7 = vld [vmem:[%s710_s3 + $0x78] sm:$0xff] }
   0xf   :  { %452 = vmatprep.subr.bf16.mxu0 %v451_v32  ;;  %468 = vmatprep.subr.bf16.mxu1 %v467_v52  ;;  %v487_v5 = vpack.c.bf16 %v236_v4, %v235_v3  ;;  %v491_v8 = vpack.c.bf16 %v238_v7, %v237_v6  ;;  %v341_v9 = vld [vmem:[%s709_s2] ss:$0 sm:$0xff]  ;;  %p519_p3 = por %p518_p2, %p517_p1 }
  0x11   :  { %p520_p4 = pnand %p519_p3, %p513_p0 }
  0x12   :  { %454 = vmatpush3.bf16.msra.mxu0 %v451_v32  ;;  %470 = vmatpush3.bf16.msra.mxu1 %v467_v52 }
  0x13   :  { %456 = vmatprep.subr.bf16.mxu0 %v455_v35  ;;  %472 = vmatprep.subr.bf16.mxu1 %v471_v55 }
  0x16   :  { %458 = vmatpush3.bf16.msra.mxu0 %v455_v35  ;;  %474 = vmatpush3.bf16.msra.mxu1 %v471_v55 }
  0x17   :  { %460 = vmatprep.subr.bf16.mxu0 %v459_v38  ;;  %476 = vmatprep.subr.bf16.mxu1 %v475_v58 }
  0x1a   :  { %462 = vmatpush3.bf16.msra.mxu0 %v459_v38  ;;  %478 = vmatpush3.bf16.msra.mxu1 %v475_v58 }
  0x1b   :  { %480 = vmatprep.subr.bf16.mxu1 %v479_v61 }
  0x1e   :  { %482 = vmatpush3.bf16.msra.mxu1 %v479_v61 }
  0x1f   :  { %484 = vmatprep.subr.bf16.mxu1 %v483_v2 }
  0x22   :  { %486 = vmatpush3.bf16.msra.mxu1 %v483_v2 }
  0x23   :  { %488 = vmatprep.subr.bf16.mxu1 %v487_v5 }
  0x26   :  { %490 = vmatpush3.bf16.msra.mxu1 %v487_v5 }
  0x27   :  { %492 = vmatprep.subr.bf16.mxu1 %v491_v8 }
  0x2a   :  { %494 = vmatpush3.bf16.msra.mxu1 %v491_v8 }
  0x74   :  { %v71_v39 = vpop.permute.xlu0 %70 }
  0x75   :  { %v85_v40 = vsel %vm84_vm6, %v57_v27, %v71_v39 }
  0x78   :  { %v73_v41 = vpop.permute.xlu0 %72 }
  0x79   :  { %v86_v44 = vsel %vm84_vm6, %v58_v31, %v73_v41 }
  0x7b   :  { %v79_v42 = vpop.permute.xlu1 %78 }
  0x7c   :  { %v88_v43 = vsel %vm87_vm7, %v85_v40, %v79_v42  ;;  %v344_v42 = vld [vmem:[%s711_s4] ss:$0 sm:$0xff] }
  0x7d   :  { %401 = vmatprep.mubr.msk.f32.mxu0 %vm109_vm8, %v88_v43 }
  0x7f   :  { %v81_v45 = vpop.permute.xlu1 %80 }
  0x80   :  { %v89_v46 = vsel %vm87_vm7, %v86_v44, %v81_v45 }
  0x81   :  { %402 = vmatmul.mubr.msk.f32.vlgmr.msra.gmra.mrb[0].mxu0 %vm109_vm8, %v89_v46 }
 0x154   :  { %v403_v10 = vpop.f32.mrb[0].mxu0 }
 0x155   :  { %v188_v11 = vadd.f32 %v403_v10, %v341_v9  ;;  %v182_v12 = vpop.f32.mrb[1].mxu0 }
 0x156   :  { %v183_v13 = vadd.f32 %v341_v9, %v182_v12 }
 0x157   :  { %v194_v14 = vmin.f32 %v188_v11, 20.0  ;;  %vm192_vm10 = vcmp.gt.f32.partialorder %v188_v11, 20.0 }
 0x158   :  { %v193_v15 = vmin.f32 %v183_v13, 20.0  ;;  %vm191_vm12 = vcmp.gt.f32.partialorder %v183_v13, 20.0 }
 0x159   :  { %v197_v16 = vmul.f32 1.442695, %v194_v14 }
 0x15a   :  { %v195_v17 = vmul.f32 1.442695, %v193_v15 }
 0x15b   :  { %500 = vpow2.f32 %v197_v16 }
 0x15c   :  { %502 = vpow2.f32 %v195_v17 }
 0x165   :  { %v501_v18 = vpop.eup %500 }
 0x166   :  { %v503_v19 = vpop.eup %502  ;;  %v208_v20 = vadd.f32 1.0, %v501_v18  ;;  %v211_v22 = vmul.f32 -0.5, %v501_v18  ;;  %v214_v25 = vand.u32 2147483647, %v501_v18 }
 0x167   :  { %v199_v21 = vadd.f32 1.0, %v503_v19  ;;  %v202_v23 = vmul.f32 -0.5, %v503_v19  ;;  %v205_v27 = vand.u32 2147483647, %v503_v19 }
 0x168   :  { %504 = vlog2.f32 %v208_v20  ;;  %v212_v24 = vadd.f32 1.0, %v211_v22  ;;  %vm215_vm9 = vcmp.lt.f32.partialorder %v214_v25, 0.0004427343 }
 0x169   :  { %506 = vlog2.f32 %v199_v21  ;;  %v203_v26 = vadd.f32 1.0, %v202_v23  ;;  %vm206_vm11 = vcmp.lt.f32.partialorder %v205_v27, 0.0004427343 }
 0x16a   :  { %v213_v31 = vmul.f32 %v501_v18, %v212_v24 }
 0x16b   :  { %v204_v33 = vmul.f32 %v503_v19, %v203_v26 }
 0x172   :  { %v505_v28 = vpop.eup %504 }
 0x173   :  { %v507_v29 = vpop.eup %506  ;;  %v210_v30 = vmul.f32 0.6931472, %v505_v28 }
 0x174   :  { %v201_v32 = vmul.f32 0.6931472, %v507_v29 }
 0x175   :  { %v216_v34 = vsel %vm215_vm9, %v213_v31, %v210_v30 }
 0x176   :  { %v218_v35 = vsel %vm192_vm10, %v188_v11, %v216_v34  ;;  %v207_v36 = vsel %vm206_vm11, %v204_v33, %v201_v32 }
 0x177   :  { %508 = vtanh.f32 %v218_v35  ;;  %v217_v37 = vsel %vm191_vm12, %v183_v13, %v207_v36 }
 0x178   :  { %510 = vtanh.f32 %v217_v37 }
 0x181   :  { %v509_v38 = vpop.eup %508 }
 0x182   :  { %v511_v39 = vpop.eup %510  ;;  %v222_v41 = vmul.f32 %v509_v38, %v188_v11 }
 0x183   :  { %v221_v40 = vmul.f32 %v511_v39, %v183_v13 }
 0x185   :  { %436 = vmatprep.mubr.f32.mxu1 %v221_v40 }
 0x186   :  { %437 = vmatmul.mubr.f32.vlgmr.msra.gmra.mrb[0].mxu1 %v222_v41 }
 0x259   :  { %v438_v43 = vpop.f32.mrb[0].mxu1 }
 0x25a   :  { %v318_v44 = vadd.f32 %v438_v43, %v344_v42  ;;  %v312_v45 = vpop.f32.mrb[1].mxu1 }
 0x25b   :  { %v313_v46 = vadd.f32 %v344_v42, %v312_v45 }
 0x25c   :  { %v322_v47 = vadd.f32 %v318_v44, %v579_v1 }
 0x25d   :  { %v321_v48 = vadd.f32 %v313_v46, %v574_v0 }
 0x25e   :  { %324 = vst.msk [vmem:[#allocation2 + $0x8] sm:$0xff] %vm84_vm6, %v322_v47 }
 0x25f   :  { %323 = vst.msk [vmem:[#allocation2] sm:$0xff] %vm84_vm6, %v321_v48 }
 0x260   :  { %523 = shalt.err (!%p520_p4)
}
 0x261   :  { %s524_s6 = scalar_lea.hbm %s712_s5, 256 }
 0x262   :  { %p525_p5 = scmp.ne.s32.totalorder %s712_s5, %s524_s6  ;;  %p528_p6 = scmp.lt.u32.totalorder %s524_s6, %s712_s5 }
 0x264   :  { %p530_p7 = pnand %p528_p6, %p525_p5 }
 0x266   :  { %533 = shalt.err (!%p530_p7)
}
 0x267   :  { %s539_s11 = smov 128   ;;  %s540_s12 = smov 8  }
 0x268   :  { %336 = dma.vmem_to_hbm [thread:$0]  %s331_s28, 256, %s712_s5, [#allocation3], %s539_s11, %s539_s11, %s540_s12  }
 0x269   :  { %534 = dma.done.wait [#allocation3], 256  }
 0x26a   :  { %535 = vsyncadd [#allocation3], 4294967040 }
 0x26b   :  { %340 = vsyncpa [#allocation3], 1 }

</bundles_post_ra>
